<compile_context>
chip_gen: v7x
topology: tpu7x:2x2x1
jax: 0.10.0
libtpu: 0.0.40
codegen_flags: <defaults>
</compile_context>

<pallas_src>
import functools

import jax
import jax.numpy as jnp
from jax.experimental import pallas as pl
from jax.experimental.pallas import tpu as pltpu

_HP = jax.lax.Precision.HIGHEST


def _round_up(n, m):
    return ((n + m - 1) // m) * m


def _mlp_kernel(x_ref, w1e_ref, wmid_ref, b_ref, o_ref, *, out_dim):
    x = x_ref[...].astype(jnp.float32)                  # (TB, D)
    w1e = w1e_ref[...]                                  # (40, D): rows 0..31 = W1^T, row 32 = 1/D
    b = b_ref[...]                                      # (32, 8): cols 0..4 biases, col 5 = colsum(W1)

    # --- fc1 with InstanceNorm folded in (contract raw x, feature-major result) ---
    # g rows 0..31 = W1^T . x ; row 32 = per-sample mean (slab carries a 1/D row).
    g = jax.lax.dot_general(w1e, x,
                            dimension_numbers=(((1,), (1,)), ((), ())),
                            precision=_HP,
                            preferred_element_type=jnp.float32)          # (40, TB)
    # E[x^2] per sample, lane-major, via the same 1/D row against x*x.
    ex2 = jax.lax.dot_general(w1e[32:40, :], x * x,
                              dimension_numbers=(((1,), (1,)), ((), ())),
                              precision=_HP,
                              preferred_element_type=jnp.float32)[0:1, :]  # (1, TB)
    mean = g[32:33, :]                                  # (1, TB)
    var = ex2 - mean * mean                             # biased variance (E[x^2]-mean^2)
    inv_std = jax.lax.rsqrt(var + 1e-5)                 # (1, TB), EUP
    s1 = b[:, 5:6]                                      # (32, 1) column sums of W1^T
    y = jnp.tanh((g[:32, :] - s1 * mean) * inv_std + b[:, 0:1])          # (32, TB)

    # --- fc2..fc5, feature-major (lane-dense elementwise + stores) -----------------
    y = jnp.tanh(jnp.dot(wmid_ref[0], y, precision=_HP,
                         preferred_element_type=jnp.float32) + b[:, 1:2])       # (32, TB)
    y = jnp.tanh(jnp.dot(wmid_ref[1][:16, :], y, precision=_HP,
                         preferred_element_type=jnp.float32) + b[:16, 2:3])     # (16, TB)
    y = jnp.tanh(jnp.dot(wmid_ref[2][:8, :16], y, precision=_HP,
                         preferred_element_type=jnp.float32) + b[:8, 3:4])      # (8, TB)
    y = jnp.dot(wmid_ref[3][:out_dim, :8], y, precision=_HP,
                preferred_element_type=jnp.float32) + b[:out_dim, 4:5]          # (out, TB)

    # Lane-dense writeback (batch on the lane axis); out-of-bounds lanes are clipped.
    o_ref[...] = y.astype(o_ref.dtype)


def _pick_tile(B, D, itemsize, block_rows, target_block_bytes):
    """Batch tile: sized by bytes, capped so the (32,TB) activation chain stays small."""
    cap = int(block_rows) if block_rows is not None else int(target_block_bytes // (itemsize * D))
    cap = max(128, min(cap, 16384))
    if B <= cap:
        return B, 1                     # single exact block: block dims == full array dims
    tb = max(128, (cap // 128) * 128)   # multiple of 128; last block is a standard partial block
    return tb, pl.cdiv(B, tb)


def build_network_medium_forward(x, packed_params, output_size, *,
                                 block_rows=None, target_block_bytes=4 << 20,
                                 feature_major=False):
    """x: (B, 1, input_size) or (B, input_size), f32 or bf16.
    Returns (B, output_size) f32 (or (output_size, B) if feature_major=True)."""
    w1e, wmid, bpk = packed_params
    B = x.shape[0]
    D = x.shape[-1]
    x2d = x.reshape(B, D)                                   # keep caller dtype; kernel upcasts
    itemsize = x2d.dtype.itemsize

    TB, nsteps = _pick_tile(B, D, itemsize, block_rows, target_block_bytes)
    grid = (nsteps,)

    w_bytes = 4 * (w1e.size + wmid.size + bpk.size)
    # Double-buffered x stream + double-buffered output + resident weights + slack
    # for the live feature-major activations; explicit so v5e's 16 MiB default scoped
    # VMEM does not bind, capped well under the v7x 64 MiB physical budget.
    need = (2 * TB * D * itemsize + 2 * output_size * TB * 4 + 2 * w_bytes + 48 * TB * 4)
    vmem_limit = int(min(max(2 * need, 16 << 20), 48 << 20))

    flops = 2 * B * (D * 33 + 32 * 32 + 32 * 16 + 16 * 8 + 8 * output_size) + 3 * B * D
    cost = pl.CostEstimate(
        flops=int(flops),
        transcendentals=int(B * (32 + 32 + 16 + 8 + 1)),      # 4x tanh layers + rsqrt
        bytes_accessed=int(itemsize * B * D + 4 * B * output_size + w_bytes))

    out_fm = pl.pallas_call(
        functools.partial(_mlp_kernel, out_dim=output_size),
        out_shape=jax.ShapeDtypeStruct((output_size, B), jnp.float32),
        grid=grid,
        in_specs=[
            pl.BlockSpec((TB, D), lambda i: (i, 0)),            # x tile (pipelined)
            pl.BlockSpec((w1e.shape[0], D), lambda i: (0, 0)),  # [W1^T ; 1/D row] (resident)
            pl.BlockSpec((4, 32, 32), lambda i: (0, 0, 0)),     # w2..w5^T padded  (resident)
            pl.BlockSpec((32, 8), lambda i: (0, 0)),            # biases + colsum  (resident)
        ],
        out_specs=pl.BlockSpec((output_size, TB), lambda i: (0, i)),
        compiler_params=pltpu.CompilerParams(
            dimension_semantics=("parallel",),
            vmem_limit_bytes=vmem_limit),
        cost_estimate=cost,
    )(x2d, w1e, wmid, bpk)

    if feature_major:
        return out_fm                 # (output_size, B): no extra HBM pass
    return out_fm.T                   # tiny transpose back to PyTorch layout (B, output_size)


def init_params(key, input_size, output_size):
    """PyTorch-style init: U(-1/sqrt(fan_in), 1/sqrt(fan_in)).
    Weights stored (in_features, out_features); biases stored (out_features,)."""
    sizes = [(input_size, 32), (32, 32), (32, 16), (16, 8), (8, output_size)]
    params = []
    for fan_in, fan_out in sizes:
        key, kw, kb = jax.random.split(key, 3)
        bound = 1.0 / float(fan_in) ** 0.5
        w = jax.random.uniform(kw, (fan_in, fan_out), jnp.float32, -bound, bound)
        b = jax.random.uniform(kb, (fan_out,), jnp.float32, -bound, bound)
        params += [w, b]
    return tuple(params)


def pack_params(raw_params, input_size, output_size):
    """Consolidate the 10 tiny parameter tensors into 3 transposed, padded slabs.
    The w1 slab carries an extra 1/D row (so the fc1 MXU pass also yields the mean);
    the bias slab carries the column sums of W1 (for the norm-folded fc1)."""
    assert output_size <= 32, "packed layout supports output_size <= 32"
    w1, b1, w2, b2, w3, b3, w4, b4, w5, b5 = raw_params
    D = input_size
    w1f = jnp.asarray(w1, jnp.float32)
    w1e = jnp.zeros((40, D), jnp.float32)                       # 32 fc1 rows + mean row, pad to 40
    w1e = w1e.at[:32, :].set(w1f.T)
    w1e = w1e.at[32, :].set(1.0 / D)
    wmid = jnp.zeros((4, 32, 32), jnp.float32)
    wmid = wmid.at[0, :32, :32].set(jnp.asarray(w2, jnp.float32).T)
    wmid = wmid.at[1, :16, :32].set(jnp.asarray(w3, jnp.float32).T)
    wmid = wmid.at[2, :8, :16].set(jnp.asarray(w4, jnp.float32).T)
    wmid = wmid.at[3, :output_size, :8].set(jnp.asarray(w5, jnp.float32).T)
    bpk = jnp.zeros((32, 8), jnp.float32)
    bpk = bpk.at[:32, 0].set(jnp.asarray(b1, jnp.float32).reshape(-1))
    bpk = bpk.at[:32, 1].set(jnp.asarray(b2, jnp.float32).reshape(-1))
    bpk = bpk.at[:16, 2].set(jnp.asarray(b3, jnp.float32).reshape(-1))
    bpk = bpk.at[:8, 3].set(jnp.asarray(b4, jnp.float32).reshape(-1))
    bpk = bpk.at[:output_size, 4].set(jnp.asarray(b5, jnp.float32).reshape(-1))
    bpk = bpk.at[:32, 5].set(jnp.sum(w1f, axis=0))              # S[f] = sum_d W1[d, f]
    return w1e, wmid, bpk


def reference_forward(x, raw_params):
    """Pure-JAX reference mirroring the PyTorch module (full f32 matmuls)."""
    w1, b1, w2, b2, w3, b3, w4, b4, w5, b5 = raw_params
    B = x.shape[0]
    h = x.reshape(B, x.shape[-1]).astype(jnp.float32)
    mean = jnp.mean(h, axis=-1, keepdims=True)
    var = jnp.mean((h - mean) ** 2, axis=-1, keepdims=True)
    h = (h - mean) * jax.lax.rsqrt(var + 1e-5)
    h = jnp.tanh(jnp.dot(h, w1, precision=_HP) + b1)
    h = jnp.tanh(jnp.dot(h, w2, precision=_HP) + b2)
    h = jnp.tanh(jnp.dot(h, w3, precision=_HP) + b3)
    h = jnp.tanh(jnp.dot(h, w4, precision=_HP) + b4)
    return jnp.dot(h, w5, precision=_HP) + b5


if __name__ == "__main__":
    input_size = 32
    output_size = 8

    key = jax.random.PRNGKey(0)
    key, kx1, kx2 = jax.random.split(key, 3)
    raw = init_params(key, input_size, output_size)
    packed = pack_params(raw, input_size, output_size)

    # Small single-tile case (B=8): block dims equal full array dims, no padding.
    x1 = jax.random.normal(kx1, (8, 1, input_size), dtype=jnp.float32)
    out1 = jax.block_until_ready(build_network_medium_forward(x1, packed, output_size))
    ref1 = reference_forward(x1, raw)
    assert out1.shape == (8, output_size)
    assert jnp.allclose(out1, ref1, atol=1e-4, rtol=1e-4), "mismatch vs reference (B=8)"

    # Multi-step grid with a ragged last block (grid=3, no wrapper pad).
    x2 = jax.random.normal(kx2, (600, 1, input_size), dtype=jnp.float32)
    out2 = jax.block_until_ready(
        build_network_medium_forward(x2, packed, output_size, block_rows=256))
    ref2 = reference_forward(x2, raw)
    assert out2.shape == (600, output_size)
    assert jnp.allclose(out2, ref2, atol=1e-4, rtol=1e-4), "mismatch vs reference (B=600)"

    # bf16 input path (halves the dominant HBM traffic); kernel math stays f32.
    x3 = x2.astype(jnp.bfloat16)
    out3 = jax.block_until_ready(build_network_medium_forward(x3, packed, output_size))
    assert out3.shape == (600, output_size)
    assert jnp.allclose(out3, ref2, atol=3e-2, rtol=3e-2), "mismatch vs reference (bf16 x)"

    # Feature-major output (skips the wrapper transpose entirely).
    out4 = jax.block_until_ready(
        build_network_medium_forward(x2, packed, output_size, feature_major=True))
    assert out4.shape == (output_size, 600)
    assert jnp.allclose(out4.T, ref2, atol=1e-4, rtol=1e-4), "mismatch vs reference (fm)"

    print("KERNEL_OK")
</pallas_src>

<mosaic_0001>
module attributes {stable_mosaic.version = 11 : i64} {
  func.func @_mlp_kernel(%arg0: i32, %arg1: memref<8x32xf32, #tpu.memory_space<vmem>>, %arg2: memref<40x32xf32, #tpu.memory_space<vmem>>, %arg3: memref<4x32x32xf32, #tpu.memory_space<vmem>>, %arg4: memref<32x8xf32, #tpu.memory_space<vmem>>, %arg5: memref<8x8xf32, #tpu.memory_space<vmem>>) attributes {dimension_semantics = [#tpu.dimension_semantics<parallel>], iteration_bounds = array<i64: 1>, scalar_prefetch = 0 : i64, scratch_operands = 0 : i64, tpu.core_type = #tpu.core_type<tc>, window_params = [{transform_indices = @transform_0, window_bounds = array<i64: 8, 32>}, {pipeline_mode = #tpu.pipeline_mode<synchronous>, transform_indices = @transform_1, window_bounds = array<i64: 40, 32>}, {pipeline_mode = #tpu.pipeline_mode<synchronous>, transform_indices = @transform_2, window_bounds = array<i64: 4, 32, 32>}, {pipeline_mode = #tpu.pipeline_mode<synchronous>, transform_indices = @transform_3, window_bounds = array<i64: 32, 8>}, {transform_indices = @transform_4, window_bounds = array<i64: 8, 8>}]} {
    %c0 = arith.constant 0 : index
    %c0_0 = arith.constant 0 : index
    %0 = vector.load %arg1[%c0, %c0_0] : memref<8x32xf32, #tpu.memory_space<vmem>>, vector<8x32xf32>
    %c0_1 = arith.constant 0 : index
    %c0_2 = arith.constant 0 : index
    %1 = vector.load %arg2[%c0_1, %c0_2] : memref<40x32xf32, #tpu.memory_space<vmem>>, vector<40x32xf32>
    %c0_3 = arith.constant 0 : index
    %c0_4 = arith.constant 0 : index
    %2 = vector.load %arg4[%c0_3, %c0_4] : memref<32x8xf32, #tpu.memory_space<vmem>>, vector<32x8xf32>
    %cst = arith.constant dense<0.000000e+00> : vector<40x8xf32>
    %3 = tpu.matmul %1, %0, %cst {dimension_numbers = #tpu.dot_dimension_numbers<[1], [1], [0], [0], [0, 0, 1, 0], [], []>, precision = #tpu.contract_precision<fp32>} : vector<40x32xf32>, vector<8x32xf32>, vector<40x8xf32> -> vector<40x8xf32>
    %4 = vector.extract_strided_slice %1 {offsets = [32, 0], sizes = [8, 32], strides = [1, 1]} : vector<40x32xf32> to vector<8x32xf32>
    %5 = arith.mulf %0, %0 : vector<8x32xf32>
    %cst_5 = arith.constant dense<0.000000e+00> : vector<8x8xf32>
    %6 = tpu.matmul %4, %5, %cst_5 {dimension_numbers = #tpu.dot_dimension_numbers<[1], [1], [0], [0], [0, 0, 1, 0], [], []>, precision = #tpu.contract_precision<fp32>} : vector<8x32xf32>, vector<8x32xf32>, vector<8x8xf32> -> vector<8x8xf32>
    %7 = vector.extract_strided_slice %6 {offsets = [0, 0], sizes = [1, 8], strides = [1, 1]} : vector<8x8xf32> to vector<1x8xf32>
    %8 = vector.extract_strided_slice %3 {offsets = [32, 0], sizes = [1, 8], strides = [1, 1]} : vector<40x8xf32> to vector<1x8xf32>
    %9 = arith.mulf %8, %8 : vector<1x8xf32>
    %10 = arith.subf %7, %9 : vector<1x8xf32>
    %cst_6 = arith.constant 9.99999974E-6 : f32
    %11 = vector.broadcast %cst_6 : f32 to vector<1x8xf32>
    %12 = arith.addf %10, %11 : vector<1x8xf32>
    %13 = math.rsqrt %12 : vector<1x8xf32>
    %14 = vector.extract_strided_slice %2 {offsets = [0, 5], sizes = [32, 1], strides = [1, 1]} : vector<32x8xf32> to vector<32x1xf32>
    %15 = vector.extract_strided_slice %3 {offsets = [0, 0], sizes = [32, 8], strides = [1, 1]} : vector<40x8xf32> to vector<32x8xf32>
    %16 = vector.broadcast %14 : vector<32x1xf32> to vector<32x8xf32>
    %17 = vector.broadcast %8 : vector<1x8xf32> to vector<32x8xf32>
    %18 = arith.mulf %16, %17 : vector<32x8xf32>
    %19 = arith.subf %15, %18 : vector<32x8xf32>
    %20 = vector.broadcast %13 : vector<1x8xf32> to vector<32x8xf32>
    %21 = arith.mulf %19, %20 : vector<32x8xf32>
    %22 = vector.extract_strided_slice %2 {offsets = [0, 0], sizes = [32, 1], strides = [1, 1]} : vector<32x8xf32> to vector<32x1xf32>
    %23 = vector.broadcast %22 : vector<32x1xf32> to vector<32x8xf32>
    %24 = arith.addf %21, %23 : vector<32x8xf32>
    %25 = math.tanh %24 : vector<32x8xf32>
    %c0_7 = arith.constant 0 : index
    %c0_8 = arith.constant 0 : index
    %c0_9 = arith.constant 0 : index
    %26 = vector.load %arg3[%c0_7, %c0_8, %c0_9] : memref<4x32x32xf32, #tpu.memory_space<vmem>>, vector<1x32x32xf32>
    %27 = vector.shape_cast %26 : vector<1x32x32xf32> to vector<32x32xf32>
    %cst_10 = arith.constant dense<0.000000e+00> : vector<32x8xf32>
    %28 = tpu.matmul %27, %25, %cst_10 {dimension_numbers = #tpu.dot_dimension_numbers<[1], [0], [0], [1], [0, 0, 1, 1], [], []>, precision = #tpu.contract_precision<fp32>} : vector<32x32xf32>, vector<32x8xf32>, vector<32x8xf32> -> vector<32x8xf32>
    %29 = vector.extract_strided_slice %2 {offsets = [0, 1], sizes = [32, 1], strides = [1, 1]} : vector<32x8xf32> to vector<32x1xf32>
    %30 = vector.broadcast %29 : vector<32x1xf32> to vector<32x8xf32>
    %31 = arith.addf %28, %30 : vector<32x8xf32>
    %32 = math.tanh %31 : vector<32x8xf32>
    %c1 = arith.constant 1 : index
    %c0_11 = arith.constant 0 : index
    %c0_12 = arith.constant 0 : index
    %33 = vector.load %arg3[%c1, %c0_11, %c0_12] : memref<4x32x32xf32, #tpu.memory_space<vmem>>, vector<1x32x32xf32>
    %34 = vector.shape_cast %33 : vector<1x32x32xf32> to vector<32x32xf32>
    %35 = vector.extract_strided_slice %34 {offsets = [0, 0], sizes = [16, 32], strides = [1, 1]} : vector<32x32xf32> to vector<16x32xf32>
    %cst_13 = arith.constant dense<0.000000e+00> : vector<16x8xf32>
    %36 = tpu.matmul %35, %32, %cst_13 {dimension_numbers = #tpu.dot_dimension_numbers<[1], [0], [0], [1], [0, 0, 1, 1], [], []>, precision = #tpu.contract_precision<fp32>} : vector<16x32xf32>, vector<32x8xf32>, vector<16x8xf32> -> vector<16x8xf32>
    %37 = vector.extract_strided_slice %2 {offsets = [0, 2], sizes = [16, 1], strides = [1, 1]} : vector<32x8xf32> to vector<16x1xf32>
    %38 = vector.broadcast %37 : vector<16x1xf32> to vector<16x8xf32>
    %39 = arith.addf %36, %38 : vector<16x8xf32>
    %40 = math.tanh %39 : vector<16x8xf32>
    %c2 = arith.constant 2 : index
    %c0_14 = arith.constant 0 : index
    %c0_15 = arith.constant 0 : index
    %41 = vector.load %arg3[%c2, %c0_14, %c0_15] : memref<4x32x32xf32, #tpu.memory_space<vmem>>, vector<1x32x32xf32>
    %42 = vector.shape_cast %41 : vector<1x32x32xf32> to vector<32x32xf32>
    %43 = vector.extract_strided_slice %42 {offsets = [0, 0], sizes = [8, 16], strides = [1, 1]} : vector<32x32xf32> to vector<8x16xf32>
    %cst_16 = arith.constant dense<0.000000e+00> : vector<8x8xf32>
    %44 = tpu.matmul %43, %40, %cst_16 {dimension_numbers = #tpu.dot_dimension_numbers<[1], [0], [0], [1], [0, 0, 1, 1], [], []>, precision = #tpu.contract_precision<fp32>} : vector<8x16xf32>, vector<16x8xf32>, vector<8x8xf32> -> vector<8x8xf32>
    %45 = vector.extract_strided_slice %2 {offsets = [0, 3], sizes = [8, 1], strides = [1, 1]} : vector<32x8xf32> to vector<8x1xf32>
    %46 = vector.broadcast %45 : vector<8x1xf32> to vector<8x8xf32>
    %47 = arith.addf %44, %46 : vector<8x8xf32>
    %48 = math.tanh %47 : vector<8x8xf32>
    %c3 = arith.constant 3 : index
    %c0_17 = arith.constant 0 : index
    %c0_18 = arith.constant 0 : index
    %49 = vector.load %arg3[%c3, %c0_17, %c0_18] : memref<4x32x32xf32, #tpu.memory_space<vmem>>, vector<1x32x32xf32>
    %50 = vector.shape_cast %49 : vector<1x32x32xf32> to vector<32x32xf32>
    %51 = vector.extract_strided_slice %50 {offsets = [0, 0], sizes = [8, 8], strides = [1, 1]} : vector<32x32xf32> to vector<8x8xf32>
    %cst_19 = arith.constant dense<0.000000e+00> : vector<8x8xf32>
    %52 = tpu.matmul %51, %48, %cst_19 {dimension_numbers = #tpu.dot_dimension_numbers<[1], [0], [0], [1], [0, 0, 1, 1], [], []>, precision = #tpu.contract_precision<fp32>} : vector<8x8xf32>, vector<8x8xf32>, vector<8x8xf32> -> vector<8x8xf32>
    %53 = vector.extract_strided_slice %2 {offsets = [0, 4], sizes = [8, 1], strides = [1, 1]} : vector<32x8xf32> to vector<8x1xf32>
    %54 = vector.broadcast %53 : vector<8x1xf32> to vector<8x8xf32>
    %55 = arith.addf %52, %54 : vector<8x8xf32>
    %c0_20 = arith.constant 0 : index
    %c0_21 = arith.constant 0 : index
    %56 = vector.load %arg5[%c0_20, %c0_21] : memref<8x8xf32, #tpu.memory_space<vmem>>, vector<8x8xf32>
    tpu.vector_store %arg5[%c0_20, %c0_21], %55 {strides = array<i32>} : memref<8x8xf32, #tpu.memory_space<vmem>>, vector<8x8xf32>,
    return
  }
  func.func @transform_0(%arg0: i32) -> (i32, i32) {
    %c0_i32 = arith.constant 0 : i32
    %c0_i32_0 = arith.constant 0 : i32
    return %arg0, %c0_i32 : i32, i32
  }
  func.func @transform_1(%arg0: i32) -> (i32, i32) {
    %c0_i32 = arith.constant 0 : i32
    %c0_i32_0 = arith.constant 0 : i32
    %c0_i32_1 = arith.constant 0 : i32
    return %c0_i32, %c0_i32_0 : i32, i32
  }
  func.func @transform_2(%arg0: i32) -> (i32, i32, i32) {
    %c0_i32 = arith.constant 0 : i32
    %c0_i32_0 = arith.constant 0 : i32
    %c0_i32_1 = arith.constant 0 : i32
    %c0_i32_2 = arith.constant 0 : i32
    return %c0_i32, %c0_i32_0, %c0_i32_1 : i32, i32, i32
  }
  func.func @transform_3(%arg0: i32) -> (i32, i32) {
    %c0_i32 = arith.constant 0 : i32
    %c0_i32_0 = arith.constant 0 : i32
    %c0_i32_1 = arith.constant 0 : i32
    return %c0_i32, %c0_i32_0 : i32, i32
  }
  func.func @transform_4(%arg0: i32) -> (i32, i32) {
    %c0_i32 = arith.constant 0 : i32
    %c0_i32_0 = arith.constant 0 : i32
    return %c0_i32, %arg0 : i32, i32
  }
}

</mosaic_0001>

<bundles_post_ra>
// kernel: tpu_custom_call.1
= control target key start
LH: loop header
LB: loop body
LE: loop exit
PB: predicated region body
PF: predicated region fallthrough
CT: control target
= control target key end

     0   :  { %9 = vsyncpa [#allocation3], 0  ;;  %s4614_s0 = inlined_call_operand.vmem [shape: f32[8,32], index: 0, kind: input, shape index: {}]   ;;  %s4615_s1 = inlined_call_operand.vmem [shape: f32[40,32], index: 1, kind: input, shape index: {}]   ;;  %s4616_s2 = inlined_call_operand.hbm [shape: f32[4,32,32], index: 2, kind: input, shape index: {}]   ;;  %s4617_s3 = inlined_call_operand.vmem [shape: f32[32,8], index: 3, kind: input, shape index: {}]   ;;  %s4618_s4 = inlined_call_operand.hbm [shape: f32[8,8], index: 4, kind: output, shape index: {}]  }
   0x1   :  { %10 = vsyncpa [#allocation4], 0  ;;  %s4179_s15 = smov [#allocation2]   ;;  %s4131_s19 = scalar_lea.hbm %s4616_s2, 2048 }
   0x2   :  { %s20_s16 = sshll.u32 %s4179_s15, 4  ;;  %p4132_p0 = scmp.ne.s32.totalorder %s4616_s2, %s4131_s19  ;;  %s21_s16 = int_to_ptr.vmem [resolvable:$true] %s20_s16 }
   0x3   :  { %p4135_p1 = scmp.lt.u32.totalorder %s4131_s19, %s4616_s2 }
   0x5   :  { %p4137_p2 = pnand %p4135_p1, %p4132_p0 }
   0x7   :  { %4140 = shalt.err (!%p4137_p2)
}
   0x8   :  { %s4141_s24 = scalar_lea.vmem %s21_s16, 2048  ;;  %p4146_p4 = scmp.lt.s32.totalorder %s21_s16, %s21_s16 }
   0x9   :  { %p4142_p3 = scmp.ne.s32.totalorder %s21_s16, %s4141_s24  ;;  %p4147_p5 = scmp.lt.s32.totalorder %s4141_s24, %s4141_s24 }
   0xb   :  { %p4148_p6 = por %p4147_p5, %p4146_p4 }
   0xd   :  { %p4149_p7 = pnand %p4148_p6, %p4142_p3 }
   0xf   :  { %4152 = shalt.err (!%p4149_p7)
}
  0x10   :  { %s4180_s25 = smov 128   ;;  %s4181_s26 = smov 8  }
  0x11   :  { %26 = dma.hbm_to_vmem [thread:$0]  %s4616_s2, 2048, %s21_s16, [#allocation3], %s4180_s25, %s4180_s25, %s4181_s26  }
  0x12   :  { %4175 = dma.done.wait [#allocation3], 2048  }
  0x13   :  { %4176 = vsyncadd [#allocation3], 4294965248  ;;  %v4182_v0 = vmov 0.0   ;;  %vm4183_vm0 = vmmov 0   ;;  %vm42_vm1 = vcmask 261120   ;;  %v32_v1 = vld [vmem:[%s4614_s0] sm:$0xff] }
  0x14   :  { %3498 = vmatprep.subr.mxu0 %v4182_v0  ;;  %3500 = vmatprep.mubr.msk.f32.mxu0 %vm4183_vm0, %v4182_v0  ;;  %v33_v2 = vld [vmem:[%s4615_s1] sm:$0xff]  ;;  %v34_v3 = vld [vmem:[%s4615_s1 + $0x8] sm:$0xff]  ;;  %v59_v4 = vsel %vm42_vm1, %v32_v1, 0  ;;  %v35_v7 = vld [vmem:[%s4615_s1 + $0x10] sm:$0xff]  ;;  %v679_v10 = vmul.f32 %v32_v1, %v32_v1  ;;  %v4184_v11 = vmov 5   ;;  %v4185_v47 = vmov 0  }
  0x15   :  { %3600 = vmatprep.subr.mxu1 %v4182_v0  ;;  %3602 = vmatprep.mubr.msk.f32.mxu1 %vm4183_vm0, %v4182_v0  ;;  %v44_v5 = vsel %vm42_vm1, %v33_v2, 0  ;;  %v47_v6 = vsel %vm42_vm1, %v34_v3, 0  ;;  %v36_v8 = vld [vmem:[%s4615_s1 + $0x18] sm:$0xff]  ;;  %v37_v9 = vld [vmem:[%s4615_s1 + $0x20] sm:$0xff]  ;;  %v4256_v12 = vand.u32 4294901760, %v59_v4  ;;  %v50_v15 = vsel %vm42_vm1, %v35_v7, 0 }
  0x16   :  { %4098 = vset.pattern.permute.xlu1 %v4184_v11  ;;  %4097 = vset.pattern.permute.xlu0 %v4184_v11  ;;  %v4258_v13 = vand.u32 4294901760, %v44_v5  ;;  %v4260_v14 = vand.u32 4294901760, %v47_v6  ;;  %v4266_v16 = vld [vmem:[%s4617_s3 + $0x10] sm:$0xff]  ;;  %v4271_v17 = vld [vmem:[%s4617_s3] sm:$0xff]  ;;  %v4273_v18 = vand.u32 4294901760, %v50_v15  ;;  %v53_v19 = vsel %vm42_vm1, %v36_v8, 0 }
  0x17   :  { %v56_v20 = vsel %vm42_vm1, %v37_v9, 0  ;;  %v681_v21 = vsel %vm42_vm1, %v679_v10, 0  ;;  %1145 = vperm.xlu1 %4098, %v4266_v16   ;;  %1135 = vperm.xlu0 %4097, %v4271_v17   ;;  %v4282_v22 = vsub.f32 %v59_v4, %v4256_v12  ;;  %v4290_v25 = vand.u32 4294901760, %v53_v19  ;;  %v4295_v26 = vld [vmem:[%s4617_s3 + $0x18] sm:$0xff]  ;;  %v4308_v30 = vld [vmem:[%s4617_s3 + $0x8] sm:$0xff]  ;;  %v1197_v56 = vld [vmem:[#allocation2] sm:$0xff] }
  0x18   :  { %3499 = vmatpush3.xpose.msra.mxu0 %v4256_v12  ;;  %v4285_v23 = vsub.f32 %v44_v5, %v4258_v13  ;;  %v4288_v24 = vsub.f32 %v47_v6, %v4260_v14  ;;  %v4298_v27 = vsub.f32 %v50_v15, %v4273_v18  ;;  %v4300_v28 = vand.u32 4294901760, %v56_v20  ;;  %s4191_s3 = smov [#allocation5]  }
  0x19   :  { %3515 = vmatprep.subr.mxu0 %v4182_v0  ;;  %v4303_v29 = vand.u32 4294901760, %v681_v21  ;;  %v180_v33 = vand.u32 4294901760, %v4282_v22  ;;  %v4314_v34 = vsub.f32 %v53_v19, %v4290_v25  ;;  %v1218_v57 = vsel %vm42_vm1, %v1197_v56, 0  ;;  %s3327_s20 = sshll.u32 %s4191_s3, 4  ;;  %s3328_s20 = int_to_ptr.vmem [resolvable:$true] %s3327_s20 }
  0x1a   :  { %v129_v31 = vand.u32 4294901760, %v4285_v23  ;;  %v139_v32 = vand.u32 4294901760, %v4288_v24  ;;  %v4317_v35 = vsub.f32 %v56_v20, %v4300_v28  ;;  %v149_v39 = vand.u32 4294901760, %v4298_v27  ;;  %s4153_s21 = scalar_lea.vmem %s3328_s20, 128  ;;  %p4158_p9 = scmp.lt.s32.totalorder %s3328_s20, %s3328_s20 }
  0x1b   :  { %3601 = vmatpush3.xpose.msra.mxu1 %v4303_v29  ;;  %v761_v36 = vsub.f32 %v681_v21, %v4303_v29  ;;  %1150 = vperm.xlu1 %4098, %v4295_v26   ;;  %v181_v40 = vsub.f32 %v4282_v22, %v180_v33  ;;  %v159_v50 = vand.u32 4294901760, %v4314_v34  ;;  %v4470_v58 = vand.u32 4294901760, %v1218_v57  ;;  %p4154_p8 = scmp.ne.s32.totalorder %s3328_s20, %s4153_s21  ;;  %p4159_p10 = scmp.lt.s32.totalorder %s4153_s21, %s4153_s21 }
  0x1c   :  { %v130_v37 = vsub.f32 %v4285_v23, %v129_v31  ;;  %v140_v38 = vsub.f32 %v4288_v24, %v139_v32  ;;  %3605 = vmatprep.subr.mxu1 %v4182_v0  ;;  %1140 = vperm.xlu0 %4097, %v4308_v30   ;;  %v4335_v41 = vand.u32 4294901760, %v4317_v35  ;;  %v150_v49 = vsub.f32 %v4298_v27, %v149_v39 }
  0x1d   :  { %v762_v42 = vand.u32 4294901760, %v761_v36  ;;  %v182_v44 = vand.u32 4294901760, %v181_v40  ;;  %v160_v54 = vsub.f32 %v4314_v34, %v159_v50  ;;  %v4473_v59 = vsub.f32 %v1218_v57, %v4470_v58  ;;  %p4160_p11 = por %p4159_p10, %p4158_p9 }
  0x1e   :  { %v131_v43 = vand.u32 4294901760, %v130_v37  ;;  %v170_v45 = vsub.f32 %v4317_v35, %v4335_v41  ;;  %v141_v48 = vand.u32 4294901760, %v140_v38  ;;  %v151_v53 = vand.u32 4294901760, %v150_v49  ;;  %v1199_v49 = vld [vmem:[#allocation2 + $0x10] sm:$0xff] }
  0x1f   :  { %v763_v46 = vsub.f32 %v761_v36, %v762_v42  ;;  %4100 = vset.pattern.permute.xlu1 %v4185_v47  ;;  %v161_v55 = vand.u32 4294901760, %v160_v54  ;;  %v1300_v60 = vand.u32 4294901760, %v4473_v59  ;;  %v4186_v2 = vmov 1   ;;  %p4161_p12 = pnand %p4160_p11, %p4154_p8 }
  0x20   :  { %3501 = vmatmul.mubr.f32.vlgmr.msra.gmra.mrb[0].mxu0 %v131_v43  ;;  %4099 = vset.pattern.permute.xlu0 %v4185_v47  ;;  %v171_v51 = vand.u32 4294901760, %v170_v45  ;;  %v1153_v7 = vlaneseq  ;;  %vm2400_vm2 = vcmask 130048   ;;  %vm2870_vm3 = vcmask 64512  }
  0x21   :  { %3503 = vmatprep.mubr.msk.f32.mxu0 %vm4183_vm0, %v4182_v0  ;;  %3516 = vmatpush3.xpose.msra.mxu0 %v182_v44  ;;  %v764_v52 = vand.u32 4294901760, %v763_v46  ;;  %v1301_v61 = vsub.f32 %v4473_v59, %v1300_v60  ;;  %v1198_v44 = vld [vmem:[#allocation2 + $0x8] sm:$0xff] }
  0x22   :  { %3532 = vmatprep.subr.mxu0 %v4182_v0  ;;  %1178 = vperm.xlu1 %4100, %v4308_v30   ;;  %v1154_v11 = vshrl.u32 %v1153_v7, 7 }
  0x23   :  { %3603 = vmatmul.mubr.f32.vlgmr.msra.gmra.mrb[0].mxu1 %v171_v51  ;;  %1174 = vperm.xlu0 %4099, %v4271_v17   ;;  %v1302_v62 = vand.u32 4294901760, %v1301_v61 }
  0x24   :  { %3504 = vmatmul.mubr.f32.gmra.mrb[2].mxu0 %v141_v48  ;;  %3606 = vmatpush3.xpose.msra.mxu1 %v764_v52  ;;  %v1155_v15 = vsub.s32 0, %v1154_v11  ;;  %v1224_v52 = vsel %vm42_vm1, %v1199_v49, 0 }
  0x25   :  { %3506 = vmatprep.mubr.msk.f32.mxu0 %vm4183_vm0, %v4182_v0  ;;  %3607 = vmatprep.mubr.msk.f32.mxu1 %vm4183_vm0, %v4182_v0 }
  0x26   :  { %3610 = vmatprep.subr.mxu1 %v4182_v0  ;;  %1182 = vperm.xlu1 %4100, %v4266_v16  }
  0x27   :  { %1186 = vperm.xlu0 %4099, %v4295_v26  }
  0x28   :  { %3507 = vmatmul.mubr.f32.gmra.mrb[4].mxu0 %v151_v53 }
  0x29   :  { %3509 = vmatprep.mubr.msk.f32.mxu0 %vm4183_vm0, %v4182_v0 }
  0x2a   :  { %4101 = vset.pattern.permute.xlu1 %v4186_v2 }
  0x2b   :  { %3608 = vmatmul.mubr.f32.vlgmr.msra.gmra.mrb[0].mxu1 %v4300_v28  ;;  %4102 = vset.pattern.permute.xlu0 %v4186_v2 }
  0x2c   :  { %3510 = vmatmul.mubr.f32.gmra.mrb[6].mxu0 %v161_v55  ;;  %3611 = vmatpush3.xpose.msra.mxu1 %v761_v36  ;;  %v4488_v55 = vand.u32 4294901760, %v1224_v52 }
  0x2d   :  { %3512 = vmatprep.mubr.msk.f32.mxu0 %vm4183_vm0, %v4182_v0  ;;  %3612 = vmatprep.mubr.msk.f32.mxu1 %vm4183_vm0, %v4182_v0 }
  0x2e   :  { %3615 = vmatprep.subr.mxu1 %v4182_v0  ;;  %1202 = vperm.xlu1 %4101, %v4271_v17   ;;  %v4496_v61 = vsub.f32 %v1224_v52, %v4488_v55 }
  0x2f   :  { %1206 = vperm.xlu0 %4102, %v4308_v30  }
  0x30   :  { %3513 = vmatmul.mubr.f32.gmra.mrb[8].mxu0 %v171_v51  ;;  %v1200_v51 = vld [vmem:[#allocation2 + $0x18] sm:$0xff] }
  0x31   :  { %3517 = vmatprep.mubr.msk.f32.mxu0 %vm4183_vm0, %v4182_v0  ;;  %v1227_v54 = vsel %vm42_vm1, %v1200_v51, 0 }
  0x32   :  { %1210 = vperm.xlu1 %4101, %v4266_v16   ;;  %v4493_v57 = vand.u32 4294901760, %v1227_v54 }
  0x33   :  { %3613 = vmatmul.mubr.f32.vlgmr.msra.gmra.mrb[0].mxu1 %v4317_v35 }
  0x34   :  { %3518 = vmatmul.mubr.f32.vlgmr.msra.gmra.mrb[0].mxu0 %v4258_v13  ;;  %3616 = vmatpush3.xpose.msra.mxu1 %v4303_v29 }
  0x35   :  { %3520 = vmatprep.mubr.msk.f32.mxu0 %vm4183_vm0, %v4182_v0  ;;  %3533 = vmatpush3.xpose.msra.mxu0 %v4282_v22 }
  0x36   :  { %3549 = vmatprep.subr.mxu0 %v4182_v0  ;;  %3617 = vmatprep.mubr.msk.f32.mxu1 %vm4183_vm0, %v4182_v0 }
  0x37   :  { %3620 = vmatprep.subr.mxu1 %v4182_v0  ;;  %1214 = vperm.xlu1 %4101, %v4295_v26  }
  0x38   :  { %3521 = vmatmul.mubr.f32.gmra.mrb[2].mxu0 %v4260_v14 }
  0x39   :  { %3523 = vmatprep.mubr.msk.f32.mxu0 %vm4183_vm0, %v4182_v0 }
  0x3b   :  { %3618 = vmatmul.mubr.f32.vlgmr.msra.gmra.mrb[0].mxu1 %v4335_v41 }
  0x3c   :  { %3524 = vmatmul.mubr.f32.gmra.mrb[4].mxu0 %v4273_v18  ;;  %3621 = vmatpush3.xpose.msra.mxu1 %v762_v42 }
  0x3d   :  { %3526 = vmatprep.mubr.msk.f32.mxu0 %vm4183_vm0, %v4182_v0  ;;  %3622 = vmatprep.mubr.msk.f32.mxu1 %vm4183_vm0, %v4182_v0 }
  0x3e   :  { %3625 = vmatprep.subr.mxu1 %v4182_v0 }
  0x40   :  { %3527 = vmatmul.mubr.f32.gmra.mrb[6].mxu0 %v4290_v25 }
  0x41   :  { %3529 = vmatprep.mubr.msk.f32.mxu0 %vm4183_vm0, %v4182_v0 }
  0x43   :  { %3623 = vmatmul.mubr.f32.vlgmr.msra.gmra.mrb[0].mxu1 %v4300_v28 }
  0x44   :  { %3530 = vmatmul.mubr.f32.gmra.mrb[8].mxu0 %v4300_v28  ;;  %3626 = vmatpush3.xpose.msra.mxu1 %v4303_v29 }
  0x45   :  { %3534 = vmatprep.mubr.msk.f32.mxu0 %vm4183_vm0, %v4182_v0  ;;  %3627 = vmatprep.mubr.msk.f32.mxu1 %vm4183_vm0, %v4182_v0 }
  0x48   :  { %3535 = vmatmul.mubr.f32.vlgmr.msra.gmra.mrb[0].mxu0 %v4285_v23 }
  0x49   :  { %3537 = vmatprep.mubr.msk.f32.mxu0 %vm4183_vm0, %v4182_v0  ;;  %3550 = vmatpush3.xpose.msra.mxu0 %v4256_v12 }
  0x4a   :  { %3566 = vmatprep.subr.mxu0 %v4182_v0 }
  0x4b   :  { %3628 = vmatmul.mubr.f32.vlgmr.msra.gmra.mrb[0].mxu1 %v4300_v28 }
  0x4c   :  { %3538 = vmatmul.mubr.f32.gmra.mrb[2].mxu0 %v4288_v24  ;;  %3638 = vmatprep.mubr.f32.mxu1 %v1302_v62 }
  0x4d   :  { %3540 = vmatprep.mubr.msk.f32.mxu0 %vm4183_vm0, %v4182_v0 }
  0x50   :  { %3541 = vmatmul.mubr.f32.gmra.mrb[4].mxu0 %v4298_v27 }
  0x51   :  { %3543 = vmatprep.mubr.msk.f32.mxu0 %vm4183_vm0, %v4182_v0 }
  0x54   :  { %3544 = vmatmul.mubr.f32.gmra.mrb[6].mxu0 %v4314_v34 }
  0x55   :  { %3546 = vmatprep.mubr.msk.f32.mxu0 %vm4183_vm0, %v4182_v0 }
  0x58   :  { %3547 = vmatmul.mubr.f32.gmra.mrb[8].mxu0 %v4317_v35 }
  0x59   :  { %3551 = vmatprep.mubr.msk.f32.mxu0 %vm4183_vm0, %v4182_v0 }
  0x5c   :  { %3552 = vmatmul.mubr.f32.vlgmr.msra.gmra.mrb[0].mxu0 %v129_v31 }
  0x5d   :  { %3554 = vmatprep.mubr.msk.f32.mxu0 %vm4183_vm0, %v4182_v0  ;;  %3567 = vmatpush3.xpose.msra.mxu0 %v180_v33 }
  0x5e   :  { %3583 = vmatprep.subr.mxu0 %v4182_v0 }
  0x60   :  { %3555 = vmatmul.mubr.f32.gmra.mrb[2].mxu0 %v139_v32 }
  0x61   :  { %3557 = vmatprep.mubr.msk.f32.mxu0 %vm4183_vm0, %v4182_v0 }
  0x64   :  { %3558 = vmatmul.mubr.f32.gmra.mrb[4].mxu0 %v149_v39 }
  0x65   :  { %3560 = vmatprep.mubr.msk.f32.mxu0 %vm4183_vm0, %v4182_v0 }
  0x68   :  { %3561 = vmatmul.mubr.f32.gmra.mrb[6].mxu0 %v159_v50  ;;  %v1221_v50 = vsel %vm42_vm1, %v1198_v44, 0 }
  0x69   :  { %3563 = vmatprep.mubr.msk.f32.mxu0 %vm4183_vm0, %v4182_v0  ;;  %v4485_v53 = vand.u32 4294901760, %v1221_v50 }
  0x6b   :  { %v4491_v56 = vsub.f32 %v1221_v50, %v4485_v53 }
  0x6c   :  { %3564 = vmatmul.mubr.f32.gmra.mrb[8].mxu0 %v4335_v41 }
  0x6d   :  { %3568 = vmatprep.mubr.msk.f32.mxu0 %vm4183_vm0, %v4182_v0  ;;  %v1310_v2 = vand.u32 4294901760, %v4491_v56 }
  0x70   :  { %3569 = vmatmul.mubr.f32.vlgmr.msra.gmra.mrb[0].mxu0 %v4258_v13 }
  0x71   :  { %3571 = vmatprep.mubr.msk.f32.mxu0 %vm4183_vm0, %v4182_v0  ;;  %3584 = vmatpush3.xpose.msra.mxu0 %v4256_v12 }
  0x74   :  { %3572 = vmatmul.mubr.f32.gmra.mrb[2].mxu0 %v4260_v14 }
  0x75   :  { %3574 = vmatprep.mubr.msk.f32.mxu0 %vm4183_vm0, %v4182_v0 }
  0x78   :  { %3575 = vmatmul.mubr.f32.gmra.mrb[4].mxu0 %v4273_v18 }
  0x79   :  { %3577 = vmatprep.mubr.msk.f32.mxu0 %vm4183_vm0, %v4182_v0 }
  0x7c   :  { %3578 = vmatmul.mubr.f32.gmra.mrb[6].mxu0 %v4290_v25 }
  0x7d   :  { %3580 = vmatprep.mubr.msk.f32.mxu0 %vm4183_vm0, %v4182_v0 }
  0x80   :  { %3581 = vmatmul.mubr.f32.gmra.mrb[8].mxu0 %v4300_v28 }
  0x81   :  { %3585 = vmatprep.mubr.msk.f32.mxu0 %vm4183_vm0, %v4182_v0 }
  0x84   :  { %3586 = vmatmul.mubr.f32.vlgmr.msra.gmra.mrb[0].mxu0 %v4258_v13 }
  0x85   :  { %3588 = vmatprep.mubr.msk.f32.mxu0 %vm4183_vm0, %v4182_v0 }
  0x88   :  { %3589 = vmatmul.mubr.f32.gmra.mrb[2].mxu0 %v4260_v14 }
  0x89   :  { %3591 = vmatprep.mubr.msk.f32.mxu0 %vm4183_vm0, %v4182_v0 }
  0x8c   :  { %3592 = vmatmul.mubr.f32.gmra.mrb[4].mxu0 %v4273_v18 }
  0x8d   :  { %3594 = vmatprep.mubr.msk.f32.mxu0 %vm4183_vm0, %v4182_v0 }
  0x90   :  { %3595 = vmatmul.mubr.f32.gmra.mrb[6].mxu0 %v4290_v25 }
  0x91   :  { %3597 = vmatprep.mubr.msk.f32.mxu0 %vm4183_vm0, %v4182_v0 }
  0x94   :  { %3598 = vmatmul.mubr.f32.gmra.mrb[8].mxu0 %v4300_v28 }
  0x95   :  { %3784 = vmatprep.mubr.msk.f32.mxu0 %vm4183_vm0, %v4182_v0 }
  0x96   :  { %v1146_v10 = vpop.permute.xlu1 %1145  ;;  %v1136_v12 = vpop.permute.xlu0 %1135 }
  0x9a   :  { %v1151_v18 = vpop.permute.xlu1 %1150 }
  0x9b   :  { %v1141_v20 = vpop.permute.xlu0 %1140 }
  0xa1   :  { %v1179_v34 = vpop.permute.xlu1 %1178 }
  0xa2   :  { %v1175_v35 = vpop.permute.xlu0 %1174 }
  0xa5   :  { %v1183_v38 = vpop.permute.xlu1 %1182 }
  0xa6   :  { %v1187_v42 = vpop.permute.xlu0 %1186 }
  0xae   :  { %v1207_v50 = vpop.permute.xlu0 %1206 }
 0x11e   :  { %v1125_v63 = vpop.f32.mrb[0].mxu1 }
 0x11f   :  { %v3629_v1 = vpop.f32.mrb[1].mxu1 }
 0x157   :  { %v651_v3 = vpop.f32.mrb[0].mxu0 }
 0x158   :  { %v3587_v4 = vpop.f32.mrb[1].mxu0 }
 0x15b   :  { %v657_v5 = vpop.f32.mrb[2].mxu0 }
 0x15c   :  { %v3590_v6 = vpop.f32.mrb[3].mxu0 }
 0x15f   :  { %v663_v8 = vpop.f32.mrb[4].mxu0 }
 0x160   :  { %v3593_v9 = vpop.f32.mrb[5].mxu0 }
 0x161   :  { %v1320_v9 = vand.u32 4294901760, %v4496_v61 }
 0x163   :  { %v669_v13 = vpop.f32.mrb[6].mxu0 }
 0x164   :  { %v3596_v14 = vpop.f32.mrb[7].mxu0 }
 0x167   :  { %v675_v19 = vpop.f32.mrb[8].mxu0 }
 0x168   :  { %v1129_v21 = vmul.f32 %v675_v19, %v675_v19  ;;  %v1156_v16 = vrot.slane %v675_v19, %v1155_v15  ;;  %v3599_v22 = vpop.f32.mrb[9].mxu0 }
 0x16a   :  { %v1130_v23 = vsub.f32 %v1125_v63, %v1129_v21  ;;  %v1160_v24 = vmul.f32 %v1156_v16, %v1151_v18  ;;  %v1158_v25 = vmul.f32 %v1156_v16, %v1141_v20  ;;  %v1157_v26 = vmul.f32 %v1156_v16, %v1136_v12 }
 0x16b   :  { %v1159_v27 = vmul.f32 %v1156_v16, %v1146_v10 }
 0x16c   :  { %v1131_v28 = vadd.f32 1e-05, %v1130_v23  ;;  %v1164_v29 = vsub.f32 %v669_v13, %v1160_v24  ;;  %v1162_v31 = vsub.f32 %v657_v5, %v1158_v25  ;;  %v1161_v32 = vsub.f32 %v651_v3, %v1157_v26 }
 0x16d   :  { %v1163_v33 = vsub.f32 %v663_v8, %v1159_v27  ;;  %v4500_v3 = vsub.f32 %v1227_v54, %v4493_v57  ;;  %v1311_v13 = vsub.f32 %v4491_v56, %v1310_v2  ;;  %v1321_v24 = vsub.f32 %v4496_v61, %v1320_v9  ;;  %v1849_v54 = vld [vmem:[#allocation2 + $0x28] sm:$0xff] }
 0x16e   :  { %4107 = vrsqrt.f32 %v1131_v28 }
 0x16f   :  { %v1330_v18 = vand.u32 4294901760, %v4500_v3 }
 0x178   :  { %v4108_v36 = vpop.eup %4107 }
 0x179   :  { %v1168_v37 = vrot.slane %v4108_v36, %v1155_v15 }
 0x17b   :  { %v1170_v39 = vmul.f32 %v1168_v37, %v1162_v31  ;;  %v1169_v40 = vmul.f32 %v1168_v37, %v1161_v32  ;;  %v1171_v41 = vmul.f32 %v1168_v37, %v1163_v33  ;;  %v1172_v43 = vmul.f32 %v1168_v37, %v1164_v29 }
 0x17c   :  { %v1312_v29 = vand.u32 4294901760, %v1311_v13 }
 0x17d   :  { %v1190_v45 = vadd.f32 %v1179_v34, %v1170_v39  ;;  %v1189_v46 = vadd.f32 %v1175_v35, %v1169_v40  ;;  %v1191_v47 = vadd.f32 %v1183_v38, %v1171_v41  ;;  %v1192_v48 = vadd.f32 %v1187_v42, %v1172_v43 }
 0x17e   :  { %v1331_v35 = vsub.f32 %v4500_v3, %v1330_v18  ;;  %v1322_v38 = vand.u32 4294901760, %v1321_v24 }
 0x17f   :  { %4109 = vtanh.f32 %v1190_v45 }
 0x180   :  { %4111 = vtanh.f32 %v1189_v46  ;;  %v1332_v42 = vand.u32 4294901760, %v1331_v35 }
 0x181   :  { %4113 = vtanh.f32 %v1191_v47  ;;  %v4187_v47 = vmov 2  }
 0x182   :  { %4115 = vtanh.f32 %v1192_v48  ;;  %4104 = vset.pattern.permute.xlu1 %v4187_v47  ;;  %4103 = vset.pattern.permute.xlu0 %v4187_v47  ;;  %v1203_v48 = vpop.permute.xlu1 %1202 }
 0x183   :  { %1855 = vperm.xlu1 %4104, %v4308_v30   ;;  %1851 = vperm.xlu0 %4103, %v4271_v17  }
 0x186   :  { %v1211_v49 = vpop.permute.xlu1 %1210 }
 0x189   :  { %v4110_v62 = vpop.eup %4109 }
 0x18a   :  { %v4112_v63 = vpop.eup %4111  ;;  %v1233_v1 = vand.u32 4294901760, %v4110_v62 }
 0x18b   :  { %v4114_v4 = vpop.eup %4113  ;;  %v1230_v5 = vand.u32 4294901760, %v4112_v63 }
 0x18c   :  { %v4116_v6 = vpop.eup %4115  ;;  %v1236_v7 = vand.u32 4294901760, %v4114_v4  ;;  %v1347_v8 = vsub.f32 %v4110_v62, %v1233_v1 }
 0x18d   :  { %v4503_v10 = vpack.c.bf16 %v1233_v1, %v1230_v5  ;;  %v1239_v11 = vand.u32 4294901760, %v4116_v6  ;;  %v1340_v12 = vsub.f32 %v4112_v63, %v1230_v5 }
 0x18e   :  { %v1348_v14 = vand.u32 4294901760, %v1347_v8  ;;  %v1354_v15 = vsub.f32 %v4114_v4, %v1236_v7 }
 0x18f   :  { %v4509_v19 = vpack.c.bf16 %v1239_v11, %v1236_v7  ;;  %3853 = vmatprep.subr.bf16.mxu1 %v4503_v10  ;;  %v1341_v20 = vand.u32 4294901760, %v1340_v12  ;;  %v1361_v21 = vsub.f32 %v4116_v6, %v1239_v11  ;;  %v3868_v16 = vpack.c.bf16 %v1347_v8, %v1340_v12 }
 0x190   :  { %3855 = vmatpush3.bf16.msra.mxu1 %v4503_v10  ;;  %v1349_v22 = vsub.f32 %v1347_v8, %v1348_v14  ;;  %v1355_v23 = vand.u32 4294901760, %v1354_v15 }
 0x191   :  { %3857 = vmatprep.subr.bf16.mxu1 %v4509_v19  ;;  %v1342_v25 = vsub.f32 %v1340_v12, %v1341_v20  ;;  %v1362_v26 = vand.u32 4294901760, %v1361_v21  ;;  %v3872_v27 = vpack.c.bf16 %v1361_v21, %v1354_v15  ;;  %v3884_v28 = vpack.c.bf16 %v1348_v14, %v1341_v20 }
 0x192   :  { %v1350_v31 = vand.u32 4294901760, %v1349_v22  ;;  %v1356_v32 = vsub.f32 %v1354_v15, %v1355_v23 }
 0x193   :  { %v1343_v33 = vand.u32 4294901760, %v1342_v25  ;;  %v1363_v34 = vsub.f32 %v1361_v21, %v1362_v26  ;;  %v3888_v36 = vpack.c.bf16 %v1362_v26, %v1355_v23 }
 0x194   :  { %3859 = vmatpush3.bf16.msra.mxu1 %v4509_v19  ;;  %v1357_v37 = vand.u32 4294901760, %v1356_v32 }
 0x195   :  { %v3860_v39 = vpack.c.bf16 %v1350_v31, %v1343_v33  ;;  %v1364_v40 = vand.u32 4294901760, %v1363_v34 }
 0x197   :  { %3639 = vmatmul.mubr.f32.vlgmr.msra.gmra.mrb[2].mxu1 %v1312_v29  ;;  %3861 = vmatprep.subr.bf16.mxu1 %v3860_v39  ;;  %v3864_v41 = vpack.c.bf16 %v1364_v40, %v1357_v37  ;;  %v4188_v40 = vmov 0.0|0.0  }
 0x198   :  { %3863 = vmatpush3.bf16.msra.mxu1 %v3860_v39  ;;  %3641 = vmatprep.mubr.f32.mxu1 %v1322_v38 }
 0x199   :  { %3865 = vmatprep.subr.bf16.mxu1 %v3864_v41  ;;  %3948 = vmatprep.subr.bf16.mxu0 %v4188_v40 }
 0x19b   :  { %3642 = vmatmul.mubr.f32.gmra.mrb[4].mxu1 %v1332_v42  ;;  %v2395_v42 = vld [vmem:[#allocation2 + $0x40] sm:$0xff] }
 0x19c   :  { %3867 = vmatpush3.bf16.msra.mxu1 %v3864_v41  ;;  %3652 = vmatprep.mubr.f32.mxu1 %v4470_v58  ;;  %v4189_v41 = vmov 3  }
 0x19d   :  { %3869 = vmatprep.subr.bf16.mxu1 %v3868_v16  ;;  %4105 = vset.pattern.permute.xlu1 %v4189_v41 }
 0x19e   :  { %2397 = vperm.xlu1 %4105, %v4271_v17  }
 0x19f   :  { %3653 = vmatmul.mubr.f32.vlgmr.msra.gmra.mrb[2].mxu1 %v4485_v53 }
 0x1a0   :  { %3871 = vmatpush3.bf16.msra.mxu1 %v3868_v16  ;;  %3655 = vmatprep.mubr.f32.mxu1 %v4488_v55 }
 0x1a1   :  { %3873 = vmatprep.subr.bf16.mxu1 %v3872_v27 }
 0x1a3   :  { %3656 = vmatmul.mubr.f32.gmra.mrb[4].mxu1 %v4493_v57 }
 0x1a4   :  { %3875 = vmatpush3.bf16.msra.mxu1 %v3872_v27  ;;  %3666 = vmatprep.mubr.f32.mxu1 %v4473_v59  ;;  %v1848_v59 = vld [vmem:[#allocation2 + $0x20] sm:$0xff] }
 0x1a5   :  { %3877 = vmatprep.subr.bf16.mxu1 %v4503_v10 }
 0x1a7   :  { %3667 = vmatmul.mubr.f32.vlgmr.msra.gmra.mrb[2].mxu1 %v4491_v56  ;;  %v1215_v56 = vpop.permute.xlu1 %1214 }
 0x1a8   :  { %3879 = vmatpush3.bf16.msra.mxu1 %v4503_v10  ;;  %3669 = vmatprep.mubr.f32.mxu1 %v4496_v61  ;;  %v1862_v61 = vsel %vm42_vm1, %v1849_v54, 0 }
 0x1a9   :  { %3881 = vmatprep.subr.bf16.mxu1 %v4509_v19  ;;  %v4558_v30 = vand.u32 4294901760, %v1862_v61 }
 0x1ab   :  { %3670 = vmatmul.mubr.f32.gmra.mrb[4].mxu1 %v4500_v3 }
 0x1ac   :  { %3883 = vmatpush3.bf16.msra.mxu1 %v4509_v19  ;;  %3680 = vmatprep.mubr.f32.mxu1 %v1300_v60  ;;  %v1859_v60 = vsel %vm42_vm1, %v1848_v59, 0 }
 0x1ad   :  { %3885 = vmatprep.subr.bf16.mxu1 %v3884_v28  ;;  %v4546_v43 = vand.u32 4294901760, %v1859_v60 }
 0x1af   :  { %3681 = vmatmul.mubr.f32.vlgmr.msra.gmra.mrb[2].mxu1 %v1310_v2  ;;  %v4549_v44 = vsub.f32 %v1859_v60, %v4546_v43  ;;  %v1944_v2 = vsub.f32 %v1862_v61, %v4558_v30 }
 0x1b0   :  { %3887 = vmatpush3.bf16.msra.mxu1 %v3884_v28  ;;  %3683 = vmatprep.mubr.f32.mxu1 %v1320_v9 }
 0x1b1   :  { %3889 = vmatprep.subr.bf16.mxu1 %v3888_v36  ;;  %v1935_v45 = vand.u32 4294901760, %v4549_v44  ;;  %v1945_v7 = vand.u32 4294901760, %v1944_v2 }
 0x1b3   :  { %3684 = vmatmul.mubr.f32.gmra.mrb[4].mxu1 %v1330_v18  ;;  %v1946_v18 = vsub.f32 %v1944_v2, %v1945_v7 }
 0x1b4   :  { %3891 = vmatpush3.bf16.msra.mxu1 %v3888_v36  ;;  %3694 = vmatprep.mubr.f32.mxu1 %v4470_v58 }
 0x1b5   :  { %3893 = vmatprep.subr.bf16.mxu1 %v4503_v10  ;;  %v1947_v28 = vand.u32 4294901760, %v1946_v18 }
 0x1b7   :  { %3695 = vmatmul.mubr.f32.vlgmr.msra.gmra.mrb[2].mxu1 %v4485_v53 }
 0x1b8   :  { %3895 = vmatpush3.bf16.msra.mxu1 %v4503_v10  ;;  %3697 = vmatprep.mubr.f32.mxu1 %v4488_v55 }
 0x1b9   :  { %3897 = vmatprep.subr.bf16.mxu1 %v4509_v19 }
 0x1bb   :  { %3698 = vmatmul.mubr.f32.gmra.mrb[4].mxu1 %v4493_v57 }
 0x1bc   :  { %3899 = vmatpush3.bf16.msra.mxu1 %v4509_v19  ;;  %3708 = vmatprep.mubr.f32.mxu1 %v4470_v58  ;;  %v1936_v58 = vsub.f32 %v4549_v44, %v1935_v45 }
 0x1be   :  { %v1937_v46 = vand.u32 4294901760, %v1936_v58 }
 0x1bf   :  { %3709 = vmatmul.mubr.f32.vlgmr.msra.gmra.mrb[2].mxu1 %v4485_v53 }
 0x1c0   :  { %3711 = vmatprep.mubr.f32.mxu1 %v4488_v55 }
 0x1c3   :  { %3712 = vmatmul.mubr.f32.gmra.mrb[4].mxu1 %v4493_v57 }
 0x1c4   :  { %3722 = vmatprep.mubr.f32.mxu1 %v1937_v46 }
 0x202   :  { %v1856_v59 = vpop.permute.xlu1 %1855  ;;  %v1852_v60 = vpop.permute.xlu0 %1851 }
 0x292   :  { %v3710_v51 = vpop.f32.mrb[2].mxu1 }
 0x293   :  { %v3966_v52 = vadd.f32 %v3710_v51, %v1207_v50  ;;  %v1821_v53 = vpop.f32.mrb[3].mxu1 }
 0x294   :  { %v3967_v55 = vadd.f32 %v1821_v53, %v1203_v48 }
 0x295   :  { %4117 = vtanh.f32 %v3966_v52 }
 0x296   :  { %4119 = vtanh.f32 %v3967_v55  ;;  %v3713_v57 = vpop.f32.mrb[4].mxu1 }
 0x297   :  { %v3968_v62 = vadd.f32 %v3713_v57, %v1215_v56  ;;  %v1833_v63 = vpop.f32.mrb[5].mxu1 }
 0x298   :  { %v3969_v1 = vadd.f32 %v1833_v63, %v1211_v49 }
 0x299   :  { %4121 = vtanh.f32 %v3968_v62 }
 0x29a   :  { %4123 = vtanh.f32 %v3969_v1 }
 0x29f   :  { %v4118_v3 = vpop.eup %4117 }
 0x2a0   :  { %v4120_v4 = vpop.eup %4119  ;;  %v1868_v5 = vand.u32 4294901760, %v4118_v3 }
 0x2a1   :  { %v1865_v6 = vand.u32 4294901760, %v4120_v4 }
 0x2a2   :  { %v1962_v8 = vsub.f32 %v4118_v3, %v1868_v5 }
 0x2a3   :  { %v4122_v9 = vpop.eup %4121  ;;  %v3900_v10 = vpack.c.bf16 %v1868_v5, %v1865_v6  ;;  %v1955_v11 = vsub.f32 %v4120_v4, %v1865_v6 }
 0x2a4   :  { %v4124_v12 = vpop.eup %4123  ;;  %v1874_v13 = vand.u32 4294901760, %v4122_v9  ;;  %v1963_v14 = vand.u32 4294901760, %v1962_v8 }
 0x2a5   :  { %v1871_v15 = vand.u32 4294901760, %v4124_v12  ;;  %3901 = vmatprep.subr.bf16.mxu1 %v3900_v10  ;;  %v1956_v19 = vand.u32 4294901760, %v1955_v11  ;;  %v3916_v20 = vpack.c.bf16 %v1962_v8, %v1955_v11 }
 0x2a6   :  { %3903 = vmatpush3.bf16.msra.mxu1 %v3900_v10  ;;  %v1964_v21 = vsub.f32 %v1962_v8, %v1963_v14  ;;  %v1976_v16 = vsub.f32 %v4122_v9, %v1874_v13  ;;  %v2865_v8 = vld [vmem:[#allocation2 + $0x60] sm:$0xff] }
 0x2a7   :  { %v3904_v22 = vpack.c.bf16 %v1874_v13, %v1871_v15  ;;  %v1957_v23 = vsub.f32 %v1955_v11, %v1956_v19  ;;  %v1969_v24 = vsub.f32 %v4124_v12, %v1871_v15  ;;  %v3932_v25 = vpack.c.bf16 %v1963_v14, %v1956_v19  ;;  %v2398_v11 = vpop.permute.xlu1 %2397 }
 0x2a8   :  { %v1965_v26 = vand.u32 4294901760, %v1964_v21  ;;  %v1977_v27 = vand.u32 4294901760, %v1976_v16  ;;  %v2872_v9 = vsel %vm2870_vm3, %v2865_v8, 0 }
 0x2a9   :  { %3905 = vmatprep.subr.bf16.mxu1 %v3904_v22  ;;  %v1958_v29 = vand.u32 4294901760, %v1957_v23  ;;  %v1970_v31 = vand.u32 4294901760, %v1969_v24  ;;  %v3920_v32 = vpack.c.bf16 %v1976_v16, %v1969_v24 }
 0x2aa   :  { %3907 = vmatpush3.bf16.msra.mxu1 %v3904_v22  ;;  %v1978_v33 = vsub.f32 %v1976_v16, %v1977_v27 }
 0x2ab   :  { %v3908_v34 = vpack.c.bf16 %v1965_v26, %v1958_v29  ;;  %v1971_v35 = vsub.f32 %v1969_v24, %v1970_v31  ;;  %v3936_v36 = vpack.c.bf16 %v1977_v27, %v1970_v31 }
 0x2ac   :  { %v1979_v37 = vand.u32 4294901760, %v1978_v33 }
 0x2ad   :  { %3723 = vmatmul.mubr.f32.vlgmr.msra.gmra.mrb[6].mxu1 %v1947_v28  ;;  %3909 = vmatprep.subr.bf16.mxu1 %v3908_v34  ;;  %v1972_v38 = vand.u32 4294901760, %v1971_v35 }
 0x2ae   :  { %3911 = vmatpush3.bf16.msra.mxu1 %v3908_v34  ;;  %3733 = vmatprep.mubr.f32.mxu1 %v4546_v43 }
 0x2af   :  { %v3912_v39 = vpack.c.bf16 %v1979_v37, %v1972_v38 }
 0x2b1   :  { %3913 = vmatprep.subr.bf16.mxu1 %v3912_v39 }
 0x2b2   :  { %3915 = vmatpush3.bf16.msra.mxu1 %v3912_v39 }
 0x2b3   :  { %3917 = vmatprep.subr.bf16.mxu1 %v3916_v20 }
 0x2b5   :  { %3734 = vmatmul.mubr.f32.vlgmr.msra.gmra.mrb[6].mxu1 %v4558_v30 }
 0x2b6   :  { %3919 = vmatpush3.bf16.msra.mxu1 %v3916_v20  ;;  %3744 = vmatprep.mubr.f32.mxu1 %v4549_v44 }
 0x2b7   :  { %3921 = vmatprep.subr.bf16.mxu1 %v3920_v32 }
 0x2ba   :  { %3923 = vmatpush3.bf16.msra.mxu1 %v3920_v32 }
 0x2bb   :  { %3925 = vmatprep.subr.bf16.mxu1 %v3900_v10 }
 0x2bd   :  { %3745 = vmatmul.mubr.f32.vlgmr.msra.gmra.mrb[6].mxu1 %v1944_v2 }
 0x2be   :  { %3927 = vmatpush3.bf16.msra.mxu1 %v3900_v10  ;;  %3755 = vmatprep.mubr.f32.mxu1 %v1935_v45 }
 0x2bf   :  { %3929 = vmatprep.subr.bf16.mxu1 %v3904_v22 }
 0x2c2   :  { %3931 = vmatpush3.bf16.msra.mxu1 %v3904_v22 }
 0x2c3   :  { %3933 = vmatprep.subr.bf16.mxu1 %v3932_v25 }
 0x2c5   :  { %3756 = vmatmul.mubr.f32.vlgmr.msra.gmra.mrb[6].mxu1 %v1945_v7  ;;  %v4190_v7 = vmov 4  }
 0x2c6   :  { %3935 = vmatpush3.bf16.msra.mxu1 %v3932_v25  ;;  %3766 = vmatprep.mubr.f32.mxu1 %v4546_v43 }
 0x2c7   :  { %3937 = vmatprep.subr.bf16.mxu1 %v3936_v36  ;;  %4106 = vset.pattern.permute.xlu0 %v4190_v7 }
 0x2c8   :  { %2867 = vperm.xlu0 %4106, %v4271_v17  }
 0x2ca   :  { %3939 = vmatpush3.bf16.msra.mxu1 %v3936_v36 }
 0x2cb   :  { %3941 = vmatprep.subr.bf16.mxu1 %v3900_v10 }
 0x2cd   :  { %3767 = vmatmul.mubr.f32.vlgmr.msra.gmra.mrb[6].mxu1 %v4558_v30 }
 0x2ce   :  { %3943 = vmatpush3.bf16.msra.mxu1 %v3900_v10  ;;  %3777 = vmatprep.mubr.f32.mxu1 %v4546_v43  ;;  %v2402_v43 = vsel %vm2400_vm2, %v2395_v42, 0  ;;  %v2940_v10 = vand.u32 4294901760, %v2872_v9 }
 0x2cf   :  { %3945 = vmatprep.subr.bf16.mxu1 %v3904_v22  ;;  %v2471_v47 = vand.u32 4294901760, %v2402_v43 }
 0x2d0   :  { %v2941_v15 = vsub.f32 %v2872_v9, %v2940_v10 }
 0x2d1   :  { %v2472_v48 = vsub.f32 %v2402_v43, %v2471_v47 }
 0x2d2   :  { %3947 = vmatpush3.bf16.msra.mxu1 %v3904_v22  ;;  %v2942_v18 = vand.u32 4294901760, %v2941_v15 }
 0x2d3   :  { %3822 = vmatprep.subr.mxu1 %v4182_v0  ;;  %v2473_v49 = vand.u32 4294901760, %v2472_v48 }
 0x2d4   :  { %v2943_v19 = vsub.f32 %v2941_v15, %v2942_v18 }
 0x2d5   :  { %3778 = vmatmul.mubr.f32.vlgmr.msra.gmra.mrb[6].mxu1 %v4558_v30  ;;  %v2474_v53 = vsub.f32 %v2472_v48, %v2473_v49 }
 0x2d6   :  { %3824 = vmatprep.mubr.msk.f32.mxu1 %vm4183_vm0, %v4182_v0  ;;  %v2944_v21 = vand.u32 4294901760, %v2943_v19 }
 0x2d7   :  { %v2475_v61 = vand.u32 4294901760, %v2474_v53 }
 0x347   :  { %v2868_v25 = vpop.permute.xlu0 %2867 }
 0x3a8   :  { %v3779_v44 = vpop.f32.mrb[6].mxu1 }
 0x3a9   :  { %v3970_v45 = vadd.f32 %v3779_v44, %v1856_v59  ;;  %v2382_v58 = vpop.f32.mrb[7].mxu1 }
 0x3aa   :  { %v3971_v46 = vadd.f32 %v2382_v58, %v1852_v60 }
 0x3ab   :  { %4125 = vtanh.f32 %v3970_v45 }
 0x3ac   :  { %4127 = vtanh.f32 %v3971_v46 }
 0x3b5   :  { %v4126_v50 = vpop.eup %4125 }
 0x3b6   :  { %v4128_v51 = vpop.eup %4127  ;;  %v2408_v52 = vand.u32 4294901760, %v4126_v50 }
 0x3b7   :  { %v2405_v54 = vand.u32 4294901760, %v4128_v51 }
 0x3b8   :  { %v2490_v55 = vsub.f32 %v4126_v50, %v2408_v52 }
 0x3b9   :  { %v3949_v56 = vpack.c.bf16 %v2408_v52, %v2405_v54  ;;  %v2483_v57 = vsub.f32 %v4128_v51, %v2405_v54 }
 0x3ba   :  { %v2491_v62 = vand.u32 4294901760, %v2490_v55 }
 0x3bb   :  { %3950 = vmatpush3.bf16.msra.mxu0 %v3949_v56  ;;  %v2484_v63 = vand.u32 4294901760, %v2483_v57  ;;  %v3955_v1 = vpack.c.bf16 %v2490_v55, %v2483_v57 }
 0x3bc   :  { %3951 = vmatprep.subr.bf16.mxu0 %v4188_v40  ;;  %v2492_v30 = vsub.f32 %v2490_v55, %v2491_v62 }
 0x3bd   :  { %v2485_v2 = vsub.f32 %v2483_v57, %v2484_v63  ;;  %v3961_v3 = vpack.c.bf16 %v2491_v62, %v2484_v63 }
 0x3be   :  { %3785 = vmatmul.mubr.f32.vlgmr.msra.gmra.mrb[10].mxu0 %v2475_v61  ;;  %v2493_v4 = vand.u32 4294901760, %v2492_v30 }
 0x3bf   :  { %v2486_v5 = vand.u32 4294901760, %v2485_v2  ;;  %3791 = vmatprep.mubr.msk.f32.mxu0 %vm4183_vm0, %v4182_v0 }
 0x3c1   :  { %v3952_v6 = vpack.c.bf16 %v2493_v4, %v2486_v5 }
 0x3c3   :  { %3953 = vmatpush3.bf16.msra.mxu0 %v3952_v6 }
 0x3c4   :  { %3954 = vmatprep.subr.bf16.mxu0 %v4188_v40 }
 0x3c6   :  { %3792 = vmatmul.mubr.f32.vlgmr.msra.gmra.mrb[10].mxu0 %v2471_v47 }
 0x3c7   :  { %3956 = vmatpush3.bf16.msra.mxu0 %v3955_v1  ;;  %3798 = vmatprep.mubr.msk.f32.mxu0 %vm4183_vm0, %v4182_v0 }
 0x3c8   :  { %3957 = vmatprep.subr.bf16.mxu0 %v4188_v40 }
 0x3ce   :  { %3799 = vmatmul.mubr.f32.vlgmr.msra.gmra.mrb[10].mxu0 %v2472_v48 }
 0x3cf   :  { %3959 = vmatpush3.bf16.msra.mxu0 %v3949_v56  ;;  %3805 = vmatprep.mubr.msk.f32.mxu0 %vm4183_vm0, %v4182_v0 }
 0x3d0   :  { %3960 = vmatprep.subr.bf16.mxu0 %v4188_v40 }
 0x3d6   :  { %3806 = vmatmul.mubr.f32.vlgmr.msra.gmra.mrb[10].mxu0 %v2473_v49 }
 0x3d7   :  { %3962 = vmatpush3.bf16.msra.mxu0 %v3961_v3  ;;  %3812 = vmatprep.mubr.msk.f32.mxu0 %vm4183_vm0, %v4182_v0 }
 0x3d8   :  { %3963 = vmatprep.subr.bf16.mxu0 %v4188_v40 }
 0x3de   :  { %3813 = vmatmul.mubr.f32.vlgmr.msra.gmra.mrb[10].mxu0 %v2471_v47 }
 0x3df   :  { %3965 = vmatpush3.bf16.msra.mxu0 %v3949_v56  ;;  %3819 = vmatprep.mubr.msk.f32.mxu0 %vm4183_vm0, %v4182_v0 }
 0x3e6   :  { %3820 = vmatmul.mubr.f32.vlgmr.msra.gmra.mrb[10].mxu0 %v2471_v47 }
 0x4b9   :  { %v2859_v12 = vpop.f32.mrb[10].mxu0 }
 0x4ba   :  { %v3972_v13 = vadd.f32 %v2859_v12, %v2398_v11  ;;  %v3821_v14 = vpop.f32.mrb[11].mxu0 }
 0x4bc   :  { %4129 = vtanh.f32 %v3972_v13 }
 0x4c6   :  { %v4130_v20 = vpop.eup %4129 }
 0x4c7   :  { %v2875_v16 = vand.u32 4294901760, %v4130_v20 }
 0x4c9   :  { %3823 = vmatpush3.msra.mxu1 %v2875_v16  ;;  %v2952_v22 = vsub.f32 %v4130_v20, %v2875_v16 }
 0x4ca   :  { %3825 = vmatmul.mubr.f32.vlgmr.msra.gmra.mrb[8].mxu1 %v2944_v21  ;;  %3827 = vmatprep.subr.mxu1 %v4182_v0 }
 0x4cb   :  { %v2953_v17 = vand.u32 4294901760, %v2952_v22  ;;  %3829 = vmatprep.mubr.msk.f32.mxu1 %vm4183_vm0, %v4182_v0 }
 0x4cd   :  { %v2954_v23 = vsub.f32 %v2952_v22, %v2953_v17 }
 0x4cf   :  { %v2955_v24 = vand.u32 4294901760, %v2954_v23 }
 0x4d1   :  { %3828 = vmatpush3.msra.mxu1 %v2955_v24 }
 0x4d2   :  { %3830 = vmatmul.mubr.f32.vlgmr.msra.gmra.mrb[8].mxu1 %v2940_v10  ;;  %3832 = vmatprep.subr.mxu1 %v4182_v0 }
 0x4d3   :  { %3833 = vmatpush3.msra.mxu1 %v2952_v22  ;;  %3834 = vmatprep.mubr.msk.f32.mxu1 %vm4183_vm0, %v4182_v0 }
 0x4d4   :  { %3837 = vmatprep.subr.mxu1 %v4182_v0 }
 0x4da   :  { %3835 = vmatmul.mubr.f32.vlgmr.msra.gmra.mrb[8].mxu1 %v2941_v15 }
 0x4db   :  { %3838 = vmatpush3.msra.mxu1 %v2875_v16  ;;  %3839 = vmatprep.mubr.msk.f32.mxu1 %vm4183_vm0, %v4182_v0 }
 0x4dc   :  { %3842 = vmatprep.subr.mxu1 %v4182_v0 }
 0x4e2   :  { %3840 = vmatmul.mubr.f32.vlgmr.msra.gmra.mrb[8].mxu1 %v2942_v18 }
 0x4e3   :  { %3843 = vmatpush3.msra.mxu1 %v2953_v17  ;;  %3844 = vmatprep.mubr.msk.f32.mxu1 %vm4183_vm0, %v4182_v0 }
 0x4e4   :  { %3847 = vmatprep.subr.mxu1 %v4182_v0 }
 0x4ea   :  { %3845 = vmatmul.mubr.f32.vlgmr.msra.gmra.mrb[8].mxu1 %v2940_v10 }
 0x4eb   :  { %3848 = vmatpush3.msra.mxu1 %v2875_v16  ;;  %3849 = vmatprep.mubr.msk.f32.mxu1 %vm4183_vm0, %v4182_v0 }
 0x4f2   :  { %3850 = vmatmul.mubr.f32.vlgmr.msra.gmra.mrb[8].mxu1 %v2940_v10 }
 0x5c5   :  { %v3316_v26 = vpop.f32.mrb[8].mxu1 }
 0x5c6   :  { %v3973_v27 = vadd.f32 %v3316_v26, %v2868_v25  ;;  %v3851_v28 = vpop.f32.mrb[9].mxu1 }
 0x5c8   :  { %3320 = vst.msk [vmem:[#allocation5] sm:$0xff] %vm2870_vm3, %v3973_v27 }
 0x5c9   :  { %4164 = shalt.err (!%p4161_p12)
}
 0x5ca   :  { %s4165_s24 = scalar_lea.hbm %s4618_s4, 128 }
 0x5cb   :  { %p4166_p13 = scmp.ne.s32.totalorder %s4618_s4, %s4165_s24  ;;  %p4169_p0 = scmp.lt.u32.totalorder %s4165_s24, %s4618_s4 }
 0x5cd   :  { %p4171_p1 = pnand %p4169_p0, %p4166_p13 }
 0x5cf   :  { %4174 = shalt.err (!%p4171_p1)
}
 0x5d0   :  { %3330 = dma.vmem_to_hbm [thread:$0]  %s3328_s20, 128, %s4618_s4, [#allocation4]  }
 0x5d1   :  { %4177 = dma.done.wait [#allocation4], 128  }
 0x5d2   :  { %4178 = vsyncadd [#allocation4], 4294967168 }
 0x5d3   :  { %3334 = vsyncpa [#allocation3], 1 }
 0x5d4   :  { %3335 = vsyncpa [#allocation4], 1 }

</bundles_post_ra>
